<compile_context>
chip_gen: v7x
topology: tpu7x:2x2x1
jax: 0.10.0
libtpu: 0.0.40
codegen_flags: <defaults>
</compile_context>

<pallas_src>
import jax
import jax.numpy as jnp
import numpy as np
from jax.experimental import pallas as pl
from jax.experimental.pallas import tpu as pltpu


def _mlp_kernel(x_ref, w1t_ref, b1_ref, w2t_ref, b2_ref, o_ref):
    # x_ref:   (TB, D)  bf16 batch tile of the input
    # w1t_ref: (D, D)   bf16 fc weight, pre-transposed
    # b1_ref:  (1, D)   f32  fc bias (lane-aligned row)
    # w2t_ref: (D, Cp)  bf16 pred1 weight, pre-transposed, lane-padded to 128
    # b2_ref:  (1, Cp)  f32  pred1 bias, lane-padded
    # o_ref:   (TB, Cp) f32  output logits tile (lane-dense)

    # fc = relu(x @ W1^T + b1)   -- dropout is identity in eval mode.
    # bf16 operands, f32 accumulation; bias/ReLU epilogue in f32 (v5e-safe).
    h = jnp.dot(x_ref[...], w1t_ref[...], preferred_element_type=jnp.float32)
    h = jnp.maximum(h + b1_ref[...], 0.0)

    # pred = h @ W2^T + b2 ; explicit bf16 downcast of the hidden activation
    # before the second MXU matmul (inference-precision choice).
    out = jnp.dot(h.astype(jnp.bfloat16), w2t_ref[...],
                  preferred_element_type=jnp.float32)
    o_ref[...] = (out + b2_ref[...]).astype(o_ref.dtype)


def prepare_params(w1, b1, w2, b2):
    """One-time weight prep: transpose, lane-pad C to a multiple of 128, cast.

    Cache the result across forward calls (these are separate XLA ops and
    weight-sized HBM traffic if re-done every step).
    """
    D = w1.shape[1]
    C = w2.shape[0]
    Cp = max(128, pl.cdiv(C, 128) * 128)

    w1t = jnp.transpose(w1).astype(jnp.bfloat16)            # (D, D)
    b1r = b1.reshape(1, D).astype(jnp.float32)               # (1, D)

    w2t = jnp.transpose(w2).astype(jnp.bfloat16)             # (D, C)
    if Cp != C:
        w2t = jnp.pad(w2t, ((0, 0), (0, Cp - C)))            # (D, Cp) zero cols
        b2p = jnp.pad(b2.astype(jnp.float32), (0, Cp - C))
    else:
        b2p = b2.astype(jnp.float32)
    b2r = b2p.reshape(1, Cp)                                  # (1, Cp)

    return dict(w1t=w1t, b1r=b1r, w2t=w2t, b2r=b2r, D=D, C=C, Cp=Cp)


def _choose_tb(B, block_b):
    """Pick a batch tile that (a) is a multiple of 8 or the full batch and
    (b) divides B so no jnp.pad of x is needed in the common case."""
    if B <= block_b:
        if B >= 16 and B % 16 == 0:
            return B // 2          # >=2 tiles -> both v7x TensorCores busy
        return B                   # single full-extent tile (any B)
    tb = (block_b // 8) * 8
    while tb >= 8:
        if B % tb == 0:
            return tb
        tb -= 8
    return (block_b // 8) * 8      # fallback: pad the last tile


def classifiercnn_forward(x, params, *, block_b=256):
    """Fused Pallas forward for Classifiercnn.

    x: (B, D); params: output of prepare_params().  Returns (B, C) f32.
    """
    B, D = x.shape
    C, Cp = params["C"], params["Cp"]
    w1t, b1r, w2t, b2r = params["w1t"], params["b1r"], params["w2t"], params["b2r"]

    x = x.astype(jnp.bfloat16)

    TB = _choose_tb(B, block_b)
    n_tiles = pl.cdiv(B, TB)
    Bpad = n_tiles * TB
    if Bpad != B:
        # Fallback only (no divisor found); padded rows are sliced off below.
        x = jnp.pad(x, ((0, Bpad - B), (0, 0)))

    # VMEM budget: single-buffered weights/biases + double-buffered x/out tiles.
    vmem_bytes = (
        w1t.size * 2 + w2t.size * 2 + b1r.size * 4 + b2r.size * 4
        + 2 * TB * D * 2          # x tiles (bf16, double-buffered)
        + 2 * TB * Cp * 4)        # out tiles (f32, double-buffered)
    vmem_limit = min(max(int(vmem_bytes * 1.5) + (2 << 20), 32 << 20), 64 << 20)

    cost = pl.CostEstimate(
        flops=2 * Bpad * D * D + 2 * Bpad * D * Cp,
        transcendentals=0,
        bytes_accessed=(Bpad * D * 2 + w1t.size * 2 + w2t.size * 2
                        + b1r.size * 4 + b2r.size * 4 + Bpad * Cp * 4),
    )

    out = pl.pallas_call(
        _mlp_kernel,
        out_shape=jax.ShapeDtypeStruct((Bpad, Cp), jnp.float32),
        grid=(n_tiles,),
        in_specs=[
            pl.BlockSpec((TB, D), lambda i: (i, 0)),
            # Constant blocks: single resident buffer (no double-buffer waste).
            pl.BlockSpec((D, D), lambda i: (0, 0), pipeline_mode=pl.Buffered(1)),
            pl.BlockSpec((1, D), lambda i: (0, 0), pipeline_mode=pl.Buffered(1)),
            pl.BlockSpec((D, Cp), lambda i: (0, 0), pipeline_mode=pl.Buffered(1)),
            pl.BlockSpec((1, Cp), lambda i: (0, 0), pipeline_mode=pl.Buffered(1)),
        ],
        out_specs=pl.BlockSpec((TB, Cp), lambda i: (i, 0)),
        compiler_params=pltpu.CompilerParams(
            dimension_semantics=("parallel",),
            vmem_limit_bytes=vmem_limit),
        cost_estimate=cost,
    )(x, w1t, b1r, w2t, b2r)

    return out[:B, :C]


def classifiercnn_reference(x, w1, b1, w2, b2):
    """Pure-JAX f32 reference (eval mode: dropout = identity)."""
    h = jnp.maximum(x @ w1.T + b1, 0.0)
    return h @ w2.T + b2


if __name__ == "__main__":
    # Small shapes consistent with the module: batch=2, inp_size=32, nclasses=4.
    batch, inp_size, nclasses = 2, 32, 4

    key = jax.random.PRNGKey(0)
    k_x, k_w1, k_b1, k_w2, k_b2 = jax.random.split(key, 5)
    x = jax.random.normal(k_x, (batch, inp_size), jnp.float32)
    w1 = 0.1 * jax.random.normal(k_w1, (inp_size, inp_size), jnp.float32)
    b1 = 0.1 * jax.random.normal(k_b1, (inp_size,), jnp.float32)
    w2 = 0.1 * jax.random.normal(k_w2, (nclasses, inp_size), jnp.float32)
    b2 = 0.1 * jax.random.normal(k_b2, (nclasses,), jnp.float32)

    # Weight prep once (cache across calls in a serving loop).
    params = prepare_params(w1, b1, w2, b2)

    out = classifiercnn_forward(x, params)
    out = jax.block_until_ready(out)
    assert out.shape == (batch, nclasses)

    ref = classifiercnn_reference(x, w1, b1, w2, b2)
    # bf16 operands with f32 accumulation -> loosened tolerance vs f32 reference.
    np.testing.assert_allclose(np.asarray(out), np.asarray(ref),
                               rtol=2e-2, atol=2e-2)
    print("KERNEL_OK")
</pallas_src>

<mosaic_0001>
module attributes {stable_mosaic.version = 11 : i64} {
  func.func @_mlp_kernel(%arg0: i32, %arg1: memref<2x32xbf16, #tpu.memory_space<vmem>>, %arg2: memref<32x32xbf16, #tpu.memory_space<vmem>>, %arg3: memref<1x32xf32, #tpu.memory_space<vmem>>, %arg4: memref<32x128xbf16, #tpu.memory_space<vmem>>, %arg5: memref<1x128xf32, #tpu.memory_space<vmem>>, %arg6: memref<2x128xf32, #tpu.memory_space<vmem>>) attributes {dimension_semantics = [#tpu.dimension_semantics<parallel>], iteration_bounds = array<i64: 1>, scalar_prefetch = 0 : i64, scratch_operands = 0 : i64, tpu.core_type = #tpu.core_type<tc>, window_params = [{transform_indices = @transform_0, window_bounds = array<i64: 2, 32>}, {pipeline_mode = #tpu.pipeline_mode<synchronous>, transform_indices = @transform_1, window_bounds = array<i64: 32, 32>}, {pipeline_mode = #tpu.pipeline_mode<synchronous>, transform_indices = @transform_2, window_bounds = array<i64: 1, 32>}, {pipeline_mode = #tpu.pipeline_mode<synchronous>, transform_indices = @transform_3, window_bounds = array<i64: 32, 128>}, {pipeline_mode = #tpu.pipeline_mode<synchronous>, transform_indices = @transform_4, window_bounds = array<i64: 1, 128>}, {transform_indices = @transform_5, window_bounds = array<i64: 2, 128>}]} {
    %c0 = arith.constant 0 : index
    %c0_0 = arith.constant 0 : index
    %0 = vector.load %arg1[%c0, %c0_0] : memref<2x32xbf16, #tpu.memory_space<vmem>>, vector<2x32xbf16>
    %c0_1 = arith.constant 0 : index
    %c0_2 = arith.constant 0 : index
    %1 = vector.load %arg2[%c0_1, %c0_2] : memref<32x32xbf16, #tpu.memory_space<vmem>>, vector<32x32xbf16>
    %cst = arith.constant dense<0.000000e+00> : vector<2x32xf32>
    %2 = tpu.matmul %0, %1, %cst {dimension_numbers = #tpu.dot_dimension_numbers<[1], [0], [0], [1], [0, 0, 1, 1], [], []>} : vector<2x32xbf16>, vector<32x32xbf16>, vector<2x32xf32> -> vector<2x32xf32>
    %c0_3 = arith.constant 0 : index
    %c0_4 = arith.constant 0 : index
    %3 = vector.load %arg3[%c0_3, %c0_4] : memref<1x32xf32, #tpu.memory_space<vmem>>, vector<1x32xf32>
    %4 = vector.broadcast %3 : vector<1x32xf32> to vector<2x32xf32>
    %5 = arith.addf %2, %4 : vector<2x32xf32>
    %cst_5 = arith.constant 0.000000e+00 : f32
    %6 = vector.broadcast %cst_5 : f32 to vector<2x32xf32>
    %7 = arith.maximumf %5, %6 : vector<2x32xf32>
    %8 = arith.truncf %7 : vector<2x32xf32> to vector<2x32xbf16>
    %c0_6 = arith.constant 0 : index
    %c0_7 = arith.constant 0 : index
    %9 = vector.load %arg4[%c0_6, %c0_7] : memref<32x128xbf16, #tpu.memory_space<vmem>>, vector<32x128xbf16>
    %cst_8 = arith.constant dense<0.000000e+00> : vector<2x128xf32>
    %10 = tpu.matmul %8, %9, %cst_8 {dimension_numbers = #tpu.dot_dimension_numbers<[1], [0], [0], [1], [0, 0, 1, 1], [], []>} : vector<2x32xbf16>, vector<32x128xbf16>, vector<2x128xf32> -> vector<2x128xf32>
    %c0_9 = arith.constant 0 : index
    %c0_10 = arith.constant 0 : index
    %11 = vector.load %arg5[%c0_9, %c0_10] : memref<1x128xf32, #tpu.memory_space<vmem>>, vector<1x128xf32>
    %12 = vector.broadcast %11 : vector<1x128xf32> to vector<2x128xf32>
    %13 = arith.addf %10, %12 : vector<2x128xf32>
    %c0_11 = arith.constant 0 : index
    %c0_12 = arith.constant 0 : index
    %14 = vector.load %arg6[%c0_11, %c0_12] : memref<2x128xf32, #tpu.memory_space<vmem>>, vector<2x128xf32>
    tpu.vector_store %arg6[%c0_11, %c0_12], %13 {strides = array<i32>} : memref<2x128xf32, #tpu.memory_space<vmem>>, vector<2x128xf32>,
    return
  }
  func.func @transform_0(%arg0: i32) -> (i32, i32) {
    %c0_i32 = arith.constant 0 : i32
    %c0_i32_0 = arith.constant 0 : i32
    return %arg0, %c0_i32 : i32, i32
  }
  func.func @transform_1(%arg0: i32) -> (i32, i32) {
    %c0_i32 = arith.constant 0 : i32
    %c0_i32_0 = arith.constant 0 : i32
    %c0_i32_1 = arith.constant 0 : i32
    return %c0_i32, %c0_i32_0 : i32, i32
  }
  func.func @transform_2(%arg0: i32) -> (i32, i32) {
    %c0_i32 = arith.constant 0 : i32
    %c0_i32_0 = arith.constant 0 : i32
    %c0_i32_1 = arith.constant 0 : i32
    return %c0_i32, %c0_i32_0 : i32, i32
  }
  func.func @transform_3(%arg0: i32) -> (i32, i32) {
    %c0_i32 = arith.constant 0 : i32
    %c0_i32_0 = arith.constant 0 : i32
    %c0_i32_1 = arith.constant 0 : i32
    return %c0_i32, %c0_i32_0 : i32, i32
  }
  func.func @transform_4(%arg0: i32) -> (i32, i32) {
    %c0_i32 = arith.constant 0 : i32
    %c0_i32_0 = arith.constant 0 : i32
    %c0_i32_1 = arith.constant 0 : i32
    return %c0_i32, %c0_i32_0 : i32, i32
  }
  func.func @transform_5(%arg0: i32) -> (i32, i32) {
    %c0_i32 = arith.constant 0 : i32
    %c0_i32_0 = arith.constant 0 : i32
    return %arg0, %c0_i32 : i32, i32
  }
}

</mosaic_0001>

<bundles_post_ra>
// kernel: tpu_custom_call.1
= control target key start
LH: loop header
LB: loop body
LE: loop exit
PB: predicated region body
PF: predicated region fallthrough
CT: control target
= control target key end

     0   :  { %10 = vsyncpa [#allocation3], 0  ;;  %s448_s0 = inlined_call_operand.hbm [shape: bf16[2,32], index: 0, kind: input, shape index: {}]   ;;  %s449_s1 = inlined_call_operand.hbm [shape: bf16[32,32], index: 1, kind: input, shape index: {}]   ;;  %s450_s2 = inlined_call_operand.vmem [shape: f32[1,32], index: 2, kind: input, shape index: {}]   ;;  %s451_s3 = inlined_call_operand.hbm [shape: bf16[32,128], index: 3, kind: input, shape index: {}]   ;;  %s452_s4 = inlined_call_operand.vmem [shape: f32[1,128], index: 4, kind: input, shape index: {}]   ;;  %s453_s5 = inlined_call_operand.hbm [shape: f32[2,128], index: 5, kind: output, shape index: {}]  }
   0x1   :  { %11 = vsyncpa [#allocation6], 0 }
   0x2   :  { %12 = vsyncpa [#allocation4], 0  ;;  %s350_s18 = smov [#allocation5]   ;;  %s256_s22 = scalar_lea.hbm %s449_s1, 256 }
   0x3   :  { %s28_s19 = sshll.u32 %s350_s18, 4  ;;  %p257_p0 = scmp.ne.s32.totalorder %s449_s1, %s256_s22  ;;  %s29_s19 = int_to_ptr.vmem [resolvable:$true] %s28_s19 }
   0x4   :  { %p260_p1 = scmp.lt.u32.totalorder %s256_s22, %s449_s1 }
   0x6   :  { %p262_p2 = pnand %p260_p1, %p257_p0 }
   0x8   :  { %265 = shalt.err (!%p262_p2)
}
   0x9   :  { %s266_s27 = scalar_lea.vmem %s29_s19, 256  ;;  %p271_p4 = scmp.lt.s32.totalorder %s29_s19, %s29_s19 }
   0xa   :  { %p267_p3 = scmp.ne.s32.totalorder %s29_s19, %s266_s27  ;;  %p272_p5 = scmp.lt.s32.totalorder %s266_s27, %s266_s27 }
   0xc   :  { %p273_p6 = por %p272_p5, %p271_p4 }
   0xe   :  { %p274_p7 = pnand %p273_p6, %p267_p3 }
  0x10   :  { %277 = shalt.err (!%p274_p7)
}
  0x11   :  { %s351_s28 = smov 64   ;;  %s352_s29 = smov 4  }
  0x12   :  { %34 = dma.hbm_to_vmem [thread:$0]  %s449_s1, 256, %s29_s19, [#allocation6], %s351_s28, %s351_s28, %s352_s29  }
  0x13   :  { %s353_s7 = smov [#allocation2]   ;;  %s354_s9 = smov [#allocation7]  }
  0x14   :  { %s19_s8 = sshll.u32 %s353_s7, 4  ;;  %s42_s10 = sshll.u32 %s354_s9, 4  ;;  %s20_s8 = int_to_ptr.vmem [resolvable:$true] %s19_s8  ;;  %s43_s10 = int_to_ptr.vmem [resolvable:$true] %s42_s10 }
  0x15   :  { %s278_s13 = scalar_lea.hbm %s448_s0, 16 }
  0x16   :  { %p279_p8 = scmp.ne.s32.totalorder %s448_s0, %s278_s13  ;;  %p282_p9 = scmp.lt.u32.totalorder %s278_s13, %s448_s0 }
  0x18   :  { %p284_p10 = pnand %p282_p9, %p279_p8 }
  0x1a   :  { %287 = shalt.err (!%p284_p10)
}
  0x1b   :  { %s288_s1 = scalar_lea.vmem %s20_s8, 16  ;;  %s292_s18 = scalar_lea.vmem %s20_s8, 32 }
  0x1c   :  { %p289_p11 = scmp.ne.s32.totalorder %s20_s8, %s288_s1  ;;  %p293_p12 = scmp.lt.s32.totalorder %s20_s8, %s20_s8 }
  0x1d   :  { %p294_p13 = scmp.lt.s32.totalorder %s292_s18, %s288_s1 }
  0x1f   :  { %p295_p0 = por %p294_p13, %p293_p12 }
  0x21   :  { %p296_p1 = pnand %p295_p0, %p289_p11 }
  0x23   :  { %299 = shalt.err (!%p296_p1)
}
  0x24   :  { %22 = dma.hbm_to_vmem [thread:$0]  %s448_s0, 16, %s20_s8, [#allocation3]  }
  0x25   :  { %s300_s23 = scalar_lea.hbm %s451_s3, 256 }
  0x26   :  { %p301_p2 = scmp.ne.s32.totalorder %s451_s3, %s300_s23  ;;  %p304_p3 = scmp.lt.u32.totalorder %s300_s23, %s451_s3 }
  0x28   :  { %p306_p4 = pnand %p304_p3, %p301_p2 }
  0x2a   :  { %309 = shalt.err (!%p306_p4)
}
  0x2b   :  { %s310_s30 = scalar_lea.vmem %s43_s10, 256  ;;  %p315_p6 = scmp.lt.s32.totalorder %s43_s10, %s43_s10 }
  0x2c   :  { %p311_p5 = scmp.ne.s32.totalorder %s43_s10, %s310_s30  ;;  %p316_p7 = scmp.lt.s32.totalorder %s310_s30, %s310_s30 }
  0x2e   :  { %p317_p8 = por %p316_p7, %p315_p6 }
  0x30   :  { %p318_p9 = pnand %p317_p8, %p311_p5 }
  0x32   :  { %321 = shalt.err (!%p318_p9)
}
  0x33   :  { %48 = dma.hbm_to_vmem [thread:$0]  %s451_s3, 256, %s43_s10, [#allocation6], %s351_s28, %s351_s28, %s352_s29  }
  0x34   :  { %344 = dma.done.wait [#allocation3], 16  }
  0x35   :  { %345 = vsyncadd [#allocation3], 4294967280 }
  0x36   :  { %346 = dma.done.wait [#allocation6], 512  }
  0x37   :  { %347 = vsyncadd [#allocation6], 4294966784  ;;  %v355_v0 = vmov 0.0   ;;  %vm356_vm0 = vmmov 0   ;;  %v252_v1 = vld [vmem:[#allocation5] sm:$0xff]   ;;  %v253_v2 = vld [vmem:[#allocation5 + $0x8] sm:$0xff]  }
  0x38   :  { %228 = vmatprep.subr.bf16.mxu0 %v355_v0  ;;  %232 = vmatprep.mubr.msk.bf16.mxu0 %vm356_vm0, %v355_v0  ;;  %v61_v3 = vld [vmem:[#allocation2] sm:$0x1]  ;;  %vm85_vm1 = vcmask 261120   ;;  %v254_v4 = vld [vmem:[#allocation7] sm:$0xff]   ;;  %s357_s8 = smov [#allocation8]  }
  0x39   :  { %236 = vmatprep.subr.bf16.mxu1 %v355_v0  ;;  %240 = vmatprep.mubr.msk.bf16.mxu1 %vm356_vm0, %v355_v0  ;;  %v255_v5 = vld [vmem:[#allocation7 + $0x8] sm:$0xff]   ;;  %s204_s9 = sshll.u32 %s357_s8, 4  ;;  %s205_s9 = int_to_ptr.vmem [resolvable:$true] %s204_s9 }
  0x3a   :  { %229 = vmatpush3.bf16.msra.mxu0 %v252_v1  ;;  %237 = vmatpush3.bf16.msra.mxu1 %v254_v4  ;;  %v214_v6 = vld [vmem:[%s450_s2] ss:$0 sm:$0xff]  ;;  %s322_s2 = scalar_lea.vmem %s205_s9, 32  ;;  %p327_p11 = scmp.lt.s32.totalorder %s205_s9, %s205_s9 }
  0x3b   :  { %230 = vmatprep.subr.bf16.mxu0 %v355_v0  ;;  %238 = vmatprep.subr.bf16.mxu1 %v355_v0  ;;  %v218_v14 = vld [vmem:[%s452_s4] ss:$0 sm:$0xff]  ;;  %p323_p10 = scmp.ne.s32.totalorder %s205_s9, %s322_s2  ;;  %p328_p12 = scmp.lt.s32.totalorder %s322_s2, %s322_s2 }
  0x3d   :  { %p329_p13 = por %p328_p12, %p327_p11 }
  0x3e   :  { %231 = vmatpush3.bf16.msra.mxu0 %v253_v2  ;;  %239 = vmatpush3.bf16.msra.mxu1 %v255_v5 }
  0x3f   :  { %p330_p0 = pnand %p329_p13, %p323_p10 }
  0x41   :  { %233 = vmatmul.mubr.msk.bf16.vlgmr.msra.gmra.mrb[0].mxu0 %vm85_vm1, %v61_v3 }
 0x114   :  { %v123_v7 = vpop.f32.mrb[0].mxu0 }
 0x115   :  { %v124_v8 = vadd.f32 %v214_v6, %v123_v7  ;;  %v234_v9 = vpop.f32.mrb[1].mxu0 }
 0x116   :  { %v126_v10 = vpop.f32.mrb[2].mxu0 }
 0x117   :  { %v129_v11 = vmax.f32 %v124_v8, 0.0  ;;  %v235_v12 = vpop.f32.mrb[3].mxu0 }
 0x119   :  { %v130_v13 = vpack.c.bf16 %v129_v11, %v129_v11 }
 0x11b   :  { %241 = vmatmul.mubr.msk.bf16.vlgmr.msra.gmra.mrb[0].mxu1 %vm85_vm1, %v130_v13 }
 0x1ee   :  { %v191_v15 = vpop.f32.mrb[0].mxu1 }
 0x1ef   :  { %v192_v16 = vadd.f32 %v218_v14, %v191_v15  ;;  %v242_v17 = vpop.f32.mrb[1].mxu1 }
 0x1f0   :  { %v194_v18 = vpop.f32.mrb[2].mxu1 }
 0x1f1   :  { %197 = vst [vmem:[#allocation8] sm:$0x3] %v192_v16  ;;  %v243_v19 = vpop.f32.mrb[3].mxu1 }
 0x1f2   :  { %333 = shalt.err (!%p330_p0)
}
 0x1f3   :  { %s334_s4 = scalar_lea.hbm %s453_s5, 32 }
 0x1f4   :  { %p335_p1 = scmp.ne.s32.totalorder %s453_s5, %s334_s4  ;;  %p338_p2 = scmp.lt.u32.totalorder %s334_s4, %s453_s5 }
 0x1f6   :  { %p340_p3 = pnand %p338_p2, %p335_p1 }
 0x1f8   :  { %343 = shalt.err (!%p340_p3)
}
 0x1f9   :  { %207 = dma.vmem_to_hbm [thread:$0]  %s205_s9, 32, %s453_s5, [#allocation4]  }
 0x1fa   :  { %348 = dma.done.wait [#allocation4], 32  }
 0x1fb   :  { %349 = vsyncadd [#allocation4], 4294967264 }
 0x1fc   :  { %211 = vsyncpa [#allocation3], 1 }
 0x1fd   :  { %212 = vsyncpa [#allocation6], 1 }
 0x1fe   :  { %213 = vsyncpa [#allocation4], 1 }

</bundles_post_ra>
